<compile_context>
chip_gen: v6e
topology: v6e:2x2x1
jax: 0.10.0
libtpu: 0.0.40
codegen_flags: <defaults>
</compile_context>

<pallas_src>
import functools

import jax
import jax.numpy as jnp
from jax import lax
from jax.experimental import pallas as pl
from jax.experimental.pallas import tpu as pltpu

LN_EPS = 1e-5                 # torch.nn.LayerNorm default
LANE = 128                    # vreg lane width
SUBLANE = 8                   # f32 sublane count
COMPUTE_DTYPE = jnp.bfloat16  # MXU input dtype (f32 accumulation)


def _round_up(x, m):
    return (x + m - 1) // m * m


# ---------------------------------------------------------------------------
# Fused kernel: (Linear -> ReLU -> LayerNorm) * L -> Linear
# ---------------------------------------------------------------------------
def _make_fused_kernel(hidden_true_dims):
    """hidden_true_dims[l] = un-padded output width of hidden layer l (for LN)."""
    L = len(hidden_true_dims)

    def kernel(*refs):
        x_ref = refs[0]
        layer_refs = refs[1:1 + 4 * L]          # (w, b, gamma, beta) per layer
        fw_ref = refs[1 + 4 * L]
        fb_ref = refs[2 + 4 * L]
        o_ref = refs[3 + 4 * L]

        h = x_ref[...]                          # [tb, D0P] bf16, padded cols = 0
        for l in range(L):                      # statically unrolled (L small)
            w_ref = layer_refs[4 * l]           # [DinP, DoutP] bf16
            b_ref = layer_refs[4 * l + 1]       # [1, DoutP]    f32
            g_ref = layer_refs[4 * l + 2]       # [1, DoutP]    f32
            beta_ref = layer_refs[4 * l + 3]    # [1, DoutP]    f32
            n = hidden_true_dims[l]

            # MXU matmul: bf16 inputs, f32 accumulation.
            z = jnp.dot(h, w_ref[...], preferred_element_type=jnp.float32)
            z = jnp.maximum(z + b_ref[...], 0.0)        # bias + ReLU (VPU)

            # LayerNorm over the TRUE n features.  Padded columns of z are
            # exactly zero (zero-padded weight cols / bias), so plain sums
            # already equal the true-feature sums; single-pass variance.
            inv_n = jnp.float32(1.0 / n)
            mean = jnp.sum(z, axis=-1, keepdims=True) * inv_n
            msq = jnp.sum(z * z, axis=-1, keepdims=True) * inv_n
            var = jnp.maximum(msq - mean * mean, 0.0)
            h32 = (z - mean) * lax.rsqrt(var + LN_EPS)
            # gamma/beta zero-padded -> padded activation columns stay exactly 0.
            h32 = h32 * g_ref[...] + beta_ref[...]
            h = h32.astype(COMPUTE_DTYPE)

        q = jnp.dot(h, fw_ref[...], preferred_element_type=jnp.float32)
        o_ref[...] = (q + fb_ref[...]).astype(o_ref.dtype)

    return kernel


# ---------------------------------------------------------------------------
# One-time parameter preparation (padding / bf16 cast happen HERE, not per call)
# ---------------------------------------------------------------------------
def prepare_params(params):
    hidden = params["hidden"]
    fw_raw, fb_raw = params["final"]

    n_state = int(hidden[0][0].shape[0]) if hidden else int(fw_raw.shape[0])
    hidden_dims = tuple(int(w.shape[1]) for (w, _, _, _) in hidden)
    n_action = int(fw_raw.shape[1])

    in_dims = (n_state,) + hidden_dims                      # input width per linear
    in_pads = tuple(_round_up(d, LANE) for d in in_dims)    # per-layer padding
    hid_pads = tuple(_round_up(d, LANE) for d in hidden_dims)
    a_pad = _round_up(n_action, LANE)

    arrays = []
    for l, (w, b, g, beta) in enumerate(hidden):
        dinp, doutp = in_pads[l], hid_pads[l]
        arrays.append(jnp.pad(w, ((0, dinp - w.shape[0]),
                                  (0, doutp - w.shape[1]))).astype(COMPUTE_DTYPE))
        arrays.append(jnp.pad(b.astype(jnp.float32), ((0, 0), (0, doutp - b.shape[1]))))
        arrays.append(jnp.pad(g.astype(jnp.float32), ((0, 0), (0, doutp - g.shape[1]))))
        arrays.append(jnp.pad(beta.astype(jnp.float32), ((0, 0), (0, doutp - beta.shape[1]))))
    dlastp = in_pads[-1]
    arrays.append(jnp.pad(fw_raw, ((0, dlastp - fw_raw.shape[0]),
                                   (0, a_pad - fw_raw.shape[1]))).astype(COMPUTE_DTYPE))
    arrays.append(jnp.pad(fb_raw.astype(jnp.float32), ((0, 0), (0, a_pad - fb_raw.shape[1]))))

    meta = (n_state, n_action, hidden_dims, in_pads, hid_pads, a_pad)
    return {"arrays": tuple(arrays), "meta": meta}


# ---------------------------------------------------------------------------
# Batch-tile selection
# ---------------------------------------------------------------------------
def _choose_batch_tile(batch):
    bs = _round_up(batch, SUBLANE)
    if bs <= 256:
        return bs                           # single step; nothing worth sharding
    # Split into >= 2 tiles (v7x: 2 TensorCores) of at most 512 rows each.
    num_tiles = max(2, pl.cdiv(bs, 512))
    return _round_up(pl.cdiv(bs, num_tiles), SUBLANE)


# ---------------------------------------------------------------------------
# Jitted forward (parameters already prepared; static meta drives the specs)
# ---------------------------------------------------------------------------
@functools.partial(jax.jit, static_argnames=("meta",))
def _forward_impl(arrays, x, *, meta):
    n_state, n_action, hidden_dims, in_pads, hid_pads, a_pad = meta
    L = len(hidden_dims)
    d0p = in_pads[0]
    dlastp = in_pads[-1]

    B = x.shape[0]
    tb = _choose_batch_tile(B)
    BP = _round_up(B, tb)
    x_pad = jnp.pad(x, ((0, BP - B), (0, d0p - n_state))).astype(COMPUTE_DTYPE)

    kernel = _make_fused_kernel(hidden_dims)

    in_specs = [pl.BlockSpec((tb, d0p), lambda i: (i, 0))]        # x batch tile
    for l in range(L):
        dinp, doutp = in_pads[l], hid_pads[l]
        in_specs.append(pl.BlockSpec((dinp, doutp), lambda i: (0, 0)))   # W_l
        for _ in range(3):                                               # b, gamma, beta
            in_specs.append(pl.BlockSpec((1, doutp), lambda i: (0, 0)))
    in_specs.append(pl.BlockSpec((dlastp, a_pad), lambda i: (0, 0)))     # final W
    in_specs.append(pl.BlockSpec((1, a_pad), lambda i: (0, 0)))          # final b

    # Advisory cost estimate for XLA scheduling.
    flops = 2 * BP * (sum(in_pads[l] * hid_pads[l] for l in range(L)) + dlastp * a_pad)
    param_bytes = sum(int(a.size) * a.dtype.itemsize for a in arrays)
    bytes_accessed = x_pad.size * 2 + param_bytes + BP * a_pad * 4
    cost = pl.CostEstimate(flops=flops, transcendentals=BP * L,
                           bytes_accessed=bytes_accessed)

    # Explicit VMEM budget: params (double-buffered by default), double-buffered
    # x/out tiles, activation intermediates + headroom.  Capped at v7x physical.
    max_feat = max(in_pads + hid_pads + (a_pad,))
    act_bytes = tb * max_feat * 4 * 8
    io_bytes = 2 * (tb * d0p * 2 + tb * a_pad * 4)
    vmem_limit = int(min(64 << 20,
                         max(16 << 20, 2 * param_bytes + io_bytes + act_bytes + (2 << 20))))

    out = pl.pallas_call(
        kernel,
        out_shape=jax.ShapeDtypeStruct((BP, a_pad), jnp.float32),
        grid_spec=pltpu.PrefetchScalarGridSpec(
            num_scalar_prefetch=0,
            grid=(BP // tb,),
            in_specs=in_specs,
            out_specs=pl.BlockSpec((tb, a_pad), lambda i: (i, 0)),   # lane-dense out
        ),
        compiler_params=pltpu.CompilerParams(
            dimension_semantics=("parallel",),
            vmem_limit_bytes=vmem_limit),
        cost_estimate=cost,
    )(x_pad, *arrays)

    return out[:B, :n_action]


def linear_dqn_forward(prepared, x):
    """x: [batch, n_state] f32 -> q-values [batch, n_action] f32."""
    return _forward_impl(prepared["arrays"], x, meta=prepared["meta"])


def eval_forward_and_pick_max(prepared, x):
    return jnp.max(linear_dqn_forward(prepared, x), axis=1, keepdims=True)


def eval_forward_and_pick_max_action(prepared, x):
    return jnp.argmax(linear_dqn_forward(prepared, x), axis=1, keepdims=True)


# ---------------------------------------------------------------------------
# Parameter init (mirrors torch nn.Linear / nn.LayerNorm defaults)
# ---------------------------------------------------------------------------
def init_linear_dqn_params(key, n_state, n_action, hidden_sizes):
    sizes = [n_state] + list(hidden_sizes)
    params = {"hidden": [], "final": None}
    for i in range(len(sizes) - 1):
        fan_in, fan_out = sizes[i], sizes[i + 1]
        key, kw, kb = jax.random.split(key, 3)
        bound = 1.0 / jnp.sqrt(fan_in)
        w = jax.random.uniform(kw, (fan_in, fan_out), jnp.float32, -bound, bound)
        b = jax.random.uniform(kb, (1, fan_out), jnp.float32, -bound, bound)
        gamma = jnp.ones((1, fan_out), jnp.float32)   # LayerNorm weight
        beta = jnp.zeros((1, fan_out), jnp.float32)   # LayerNorm bias
        params["hidden"].append((w, b, gamma, beta))
    fan_in = sizes[-1]
    key, kw, kb = jax.random.split(key, 3)
    bound = 1.0 / jnp.sqrt(fan_in)
    w = jax.random.uniform(kw, (fan_in, n_action), jnp.float32, -bound, bound)
    b = jax.random.uniform(kb, (1, n_action), jnp.float32, -bound, bound)
    params["final"] = (w, b)
    return params


# ---------------------------------------------------------------------------
# Pure-JAX references for sanity checks
# ---------------------------------------------------------------------------
def _reference_forward_bf16(params, x):
    """Matches the kernel's compute recipe (bf16 MXU inputs, f32 accum)."""
    h = x
    for (w, b, gamma, beta) in params["hidden"]:
        z = jnp.dot(h.astype(COMPUTE_DTYPE), w.astype(COMPUTE_DTYPE),
                    preferred_element_type=jnp.float32) + b
        z = jnp.maximum(z, 0.0)
        mean = jnp.mean(z, axis=-1, keepdims=True)
        var = jnp.mean((z - mean) ** 2, axis=-1, keepdims=True)
        h = (z - mean) * jax.lax.rsqrt(var + LN_EPS) * gamma + beta
    w, b = params["final"]
    return jnp.dot(h.astype(COMPUTE_DTYPE), w.astype(COMPUTE_DTYPE),
                   preferred_element_type=jnp.float32) + b


def _reference_forward_f32(params, x):
    """Full-f32 torch-equivalent reference (semantic check, looser tolerance)."""
    h = x
    for (w, b, gamma, beta) in params["hidden"]:
        z = jnp.maximum(h @ w + b, 0.0)
        mean = jnp.mean(z, axis=-1, keepdims=True)
        var = jnp.mean((z - mean) ** 2, axis=-1, keepdims=True)
        h = (z - mean) * jax.lax.rsqrt(var + LN_EPS) * gamma + beta
    w, b = params["final"]
    return h @ w + b


if __name__ == "__main__":
    key = jax.random.PRNGKey(0)

    # Small shapes consistent with the module: state vector in, q-values out.
    batch = 2
    n_state = 16
    n_action = 8
    hidden_sizes = [32, 32]

    kp, kx, kx2 = jax.random.split(key, 3)
    params = init_linear_dqn_params(kp, n_state, n_action, hidden_sizes)
    prepared = prepare_params(params)            # one-time pad/stack/bf16 cast
    x = jax.random.normal(kx, (batch, n_state), jnp.float32)

    q = linear_dqn_forward(prepared, x)
    q = jax.block_until_ready(q)
    assert q.shape == (batch, n_action)

    # Tight check vs. the matched (bf16-weight, f32-accum) reference.
    q_ref = _reference_forward_bf16(params, x)
    assert jnp.allclose(q, q_ref, atol=2e-3, rtol=2e-3), "mismatch vs bf16 ref"

    # Loose semantic check vs. the full-f32 torch-equivalent reference.
    q_ref32 = _reference_forward_f32(params, x)
    assert jnp.allclose(q, q_ref32, atol=1e-1, rtol=1e-1), "mismatch vs f32 ref"

    # Multi-tile batch path (exercises the batch grid / "parallel" sharding).
    xb = jax.random.normal(kx2, (300, n_state), jnp.float32)
    qb = jax.block_until_ready(linear_dqn_forward(prepared, xb))
    assert qb.shape == (300, n_action)
    assert jnp.allclose(qb, _reference_forward_bf16(params, xb),
                        atol=2e-3, rtol=2e-3), "mismatch vs bf16 ref (batched)"

    print("KERNEL_OK")
</pallas_src>

<mosaic_0001>
module attributes {stable_mosaic.version = 11 : i64} {
  func.func @kernel(%arg0: i32, %arg1: memref<8x128xbf16, #tpu.memory_space<vmem>>, %arg2: memref<128x128xbf16, #tpu.memory_space<vmem>>, %arg3: memref<1x128xf32, #tpu.memory_space<vmem>>, %arg4: memref<1x128xf32, #tpu.memory_space<vmem>>, %arg5: memref<1x128xf32, #tpu.memory_space<vmem>>, %arg6: memref<128x128xbf16, #tpu.memory_space<vmem>>, %arg7: memref<1x128xf32, #tpu.memory_space<vmem>>, %arg8: memref<1x128xf32, #tpu.memory_space<vmem>>, %arg9: memref<1x128xf32, #tpu.memory_space<vmem>>, %arg10: memref<128x128xbf16, #tpu.memory_space<vmem>>, %arg11: memref<1x128xf32, #tpu.memory_space<vmem>>, %arg12: memref<8x128xf32, #tpu.memory_space<vmem>>) attributes {dimension_semantics = [#tpu.dimension_semantics<parallel>], iteration_bounds = array<i64: 1>, scalar_prefetch = 0 : i64, scratch_operands = 0 : i64, tpu.core_type = #tpu.core_type<tc>, window_params = [{transform_indices = @transform_0, window_bounds = array<i64: 8, 128>}, {pipeline_mode = #tpu.pipeline_mode<synchronous>, transform_indices = @transform_1, window_bounds = array<i64: 128, 128>}, {pipeline_mode = #tpu.pipeline_mode<synchronous>, transform_indices = @transform_2, window_bounds = array<i64: 1, 128>}, {pipeline_mode = #tpu.pipeline_mode<synchronous>, transform_indices = @transform_3, window_bounds = array<i64: 1, 128>}, {pipeline_mode = #tpu.pipeline_mode<synchronous>, transform_indices = @transform_4, window_bounds = array<i64: 1, 128>}, {pipeline_mode = #tpu.pipeline_mode<synchronous>, transform_indices = @transform_5, window_bounds = array<i64: 128, 128>}, {pipeline_mode = #tpu.pipeline_mode<synchronous>, transform_indices = @transform_6, window_bounds = array<i64: 1, 128>}, {pipeline_mode = #tpu.pipeline_mode<synchronous>, transform_indices = @transform_7, window_bounds = array<i64: 1, 128>}, {pipeline_mode = #tpu.pipeline_mode<synchronous>, transform_indices = @transform_8, window_bounds = array<i64: 1, 128>}, {pipeline_mode = #tpu.pipeline_mode<synchronous>, transform_indices = @transform_9, window_bounds = array<i64: 128, 128>}, {pipeline_mode = #tpu.pipeline_mode<synchronous>, transform_indices = @transform_10, window_bounds = array<i64: 1, 128>}, {transform_indices = @transform_11, window_bounds = array<i64: 8, 128>}]} {
    %c0 = arith.constant 0 : index
    %c0_0 = arith.constant 0 : index
    %0 = vector.load %arg1[%c0, %c0_0] : memref<8x128xbf16, #tpu.memory_space<vmem>>, vector<8x128xbf16>
    %c0_1 = arith.constant 0 : index
    %c0_2 = arith.constant 0 : index
    %1 = vector.load %arg2[%c0_1, %c0_2] : memref<128x128xbf16, #tpu.memory_space<vmem>>, vector<128x128xbf16>
    %cst = arith.constant dense<0.000000e+00> : vector<8x128xf32>
    %2 = tpu.matmul %0, %1, %cst {dimension_numbers = #tpu.dot_dimension_numbers<[1], [0], [0], [1], [0, 0, 1, 1], [], []>} : vector<8x128xbf16>, vector<128x128xbf16>, vector<8x128xf32> -> vector<8x128xf32>
    %c0_3 = arith.constant 0 : index
    %c0_4 = arith.constant 0 : index
    %3 = vector.load %arg3[%c0_3, %c0_4] : memref<1x128xf32, #tpu.memory_space<vmem>>, vector<1x128xf32>
    %4 = vector.broadcast %3 : vector<1x128xf32> to vector<8x128xf32>
    %5 = arith.addf %2, %4 : vector<8x128xf32>
    %cst_5 = arith.constant 0.000000e+00 : f32
    %6 = vector.broadcast %cst_5 : f32 to vector<8x128xf32>
    %7 = arith.maximumf %5, %6 : vector<8x128xf32>
    %cst_6 = arith.constant dense<0.000000e+00> : vector<8xf32>
    %8 = vector.multi_reduction <add>, %7, %cst_6 [1] : vector<8x128xf32> to vector<8xf32>
    %9 = vector.shape_cast %8 : vector<8xf32> to vector<8x1xf32>
    %cst_7 = arith.constant 3.125000e-02 : f32
    %10 = vector.broadcast %cst_7 : f32 to vector<8x1xf32>
    %11 = arith.mulf %9, %10 : vector<8x1xf32>
    %12 = arith.mulf %7, %7 : vector<8x128xf32>
    %cst_8 = arith.constant dense<0.000000e+00> : vector<8xf32>
    %13 = vector.multi_reduction <add>, %12, %cst_8 [1] : vector<8x128xf32> to vector<8xf32>
    %14 = vector.shape_cast %13 : vector<8xf32> to vector<8x1xf32>
    %cst_9 = arith.constant 3.125000e-02 : f32
    %15 = vector.broadcast %cst_9 : f32 to vector<8x1xf32>
    %16 = arith.mulf %14, %15 : vector<8x1xf32>
    %17 = arith.mulf %11, %11 : vector<8x1xf32>
    %18 = arith.subf %16, %17 : vector<8x1xf32>
    %cst_10 = arith.constant 0.000000e+00 : f32
    %19 = vector.broadcast %cst_10 : f32 to vector<8x1xf32>
    %20 = arith.maximumf %18, %19 : vector<8x1xf32>
    %21 = vector.broadcast %11 : vector<8x1xf32> to vector<8x128xf32>
    %22 = arith.subf %7, %21 : vector<8x128xf32>
    %cst_11 = arith.constant 9.99999974E-6 : f32
    %23 = vector.broadcast %cst_11 : f32 to vector<8x1xf32>
    %24 = arith.addf %20, %23 : vector<8x1xf32>
    %25 = math.rsqrt %24 : vector<8x1xf32>
    %26 = vector.broadcast %25 : vector<8x1xf32> to vector<8x128xf32>
    %27 = arith.mulf %22, %26 : vector<8x128xf32>
    %c0_12 = arith.constant 0 : index
    %c0_13 = arith.constant 0 : index
    %28 = vector.load %arg4[%c0_12, %c0_13] : memref<1x128xf32, #tpu.memory_space<vmem>>, vector<1x128xf32>
    %29 = vector.broadcast %28 : vector<1x128xf32> to vector<8x128xf32>
    %30 = arith.mulf %27, %29 : vector<8x128xf32>
    %c0_14 = arith.constant 0 : index
    %c0_15 = arith.constant 0 : index
    %31 = vector.load %arg5[%c0_14, %c0_15] : memref<1x128xf32, #tpu.memory_space<vmem>>, vector<1x128xf32>
    %32 = vector.broadcast %31 : vector<1x128xf32> to vector<8x128xf32>
    %33 = arith.addf %30, %32 : vector<8x128xf32>
    %34 = arith.truncf %33 : vector<8x128xf32> to vector<8x128xbf16>
    %c0_16 = arith.constant 0 : index
    %c0_17 = arith.constant 0 : index
    %35 = vector.load %arg6[%c0_16, %c0_17] : memref<128x128xbf16, #tpu.memory_space<vmem>>, vector<128x128xbf16>
    %cst_18 = arith.constant dense<0.000000e+00> : vector<8x128xf32>
    %36 = tpu.matmul %34, %35, %cst_18 {dimension_numbers = #tpu.dot_dimension_numbers<[1], [0], [0], [1], [0, 0, 1, 1], [], []>} : vector<8x128xbf16>, vector<128x128xbf16>, vector<8x128xf32> -> vector<8x128xf32>
    %c0_19 = arith.constant 0 : index
    %c0_20 = arith.constant 0 : index
    %37 = vector.load %arg7[%c0_19, %c0_20] : memref<1x128xf32, #tpu.memory_space<vmem>>, vector<1x128xf32>
    %38 = vector.broadcast %37 : vector<1x128xf32> to vector<8x128xf32>
    %39 = arith.addf %36, %38 : vector<8x128xf32>
    %cst_21 = arith.constant 0.000000e+00 : f32
    %40 = vector.broadcast %cst_21 : f32 to vector<8x128xf32>
    %41 = arith.maximumf %39, %40 : vector<8x128xf32>
    %cst_22 = arith.constant dense<0.000000e+00> : vector<8xf32>
    %42 = vector.multi_reduction <add>, %41, %cst_22 [1] : vector<8x128xf32> to vector<8xf32>
    %43 = vector.shape_cast %42 : vector<8xf32> to vector<8x1xf32>
    %cst_23 = arith.constant 3.125000e-02 : f32
    %44 = vector.broadcast %cst_23 : f32 to vector<8x1xf32>
    %45 = arith.mulf %43, %44 : vector<8x1xf32>
    %46 = arith.mulf %41, %41 : vector<8x128xf32>
    %cst_24 = arith.constant dense<0.000000e+00> : vector<8xf32>
    %47 = vector.multi_reduction <add>, %46, %cst_24 [1] : vector<8x128xf32> to vector<8xf32>
    %48 = vector.shape_cast %47 : vector<8xf32> to vector<8x1xf32>
    %cst_25 = arith.constant 3.125000e-02 : f32
    %49 = vector.broadcast %cst_25 : f32 to vector<8x1xf32>
    %50 = arith.mulf %48, %49 : vector<8x1xf32>
    %51 = arith.mulf %45, %45 : vector<8x1xf32>
    %52 = arith.subf %50, %51 : vector<8x1xf32>
    %cst_26 = arith.constant 0.000000e+00 : f32
    %53 = vector.broadcast %cst_26 : f32 to vector<8x1xf32>
    %54 = arith.maximumf %52, %53 : vector<8x1xf32>
    %55 = vector.broadcast %45 : vector<8x1xf32> to vector<8x128xf32>
    %56 = arith.subf %41, %55 : vector<8x128xf32>
    %cst_27 = arith.constant 9.99999974E-6 : f32
    %57 = vector.broadcast %cst_27 : f32 to vector<8x1xf32>
    %58 = arith.addf %54, %57 : vector<8x1xf32>
    %59 = math.rsqrt %58 : vector<8x1xf32>
    %60 = vector.broadcast %59 : vector<8x1xf32> to vector<8x128xf32>
    %61 = arith.mulf %56, %60 : vector<8x128xf32>
    %c0_28 = arith.constant 0 : index
    %c0_29 = arith.constant 0 : index
    %62 = vector.load %arg8[%c0_28, %c0_29] : memref<1x128xf32, #tpu.memory_space<vmem>>, vector<1x128xf32>
    %63 = vector.broadcast %62 : vector<1x128xf32> to vector<8x128xf32>
    %64 = arith.mulf %61, %63 : vector<8x128xf32>
    %c0_30 = arith.constant 0 : index
    %c0_31 = arith.constant 0 : index
    %65 = vector.load %arg9[%c0_30, %c0_31] : memref<1x128xf32, #tpu.memory_space<vmem>>, vector<1x128xf32>
    %66 = vector.broadcast %65 : vector<1x128xf32> to vector<8x128xf32>
    %67 = arith.addf %64, %66 : vector<8x128xf32>
    %68 = arith.truncf %67 : vector<8x128xf32> to vector<8x128xbf16>
    %c0_32 = arith.constant 0 : index
    %c0_33 = arith.constant 0 : index
    %69 = vector.load %arg10[%c0_32, %c0_33] : memref<128x128xbf16, #tpu.memory_space<vmem>>, vector<128x128xbf16>
    %cst_34 = arith.constant dense<0.000000e+00> : vector<8x128xf32>
    %70 = tpu.matmul %68, %69, %cst_34 {dimension_numbers = #tpu.dot_dimension_numbers<[1], [0], [0], [1], [0, 0, 1, 1], [], []>} : vector<8x128xbf16>, vector<128x128xbf16>, vector<8x128xf32> -> vector<8x128xf32>
    %c0_35 = arith.constant 0 : index
    %c0_36 = arith.constant 0 : index
    %71 = vector.load %arg11[%c0_35, %c0_36] : memref<1x128xf32, #tpu.memory_space<vmem>>, vector<1x128xf32>
    %72 = vector.broadcast %71 : vector<1x128xf32> to vector<8x128xf32>
    %73 = arith.addf %70, %72 : vector<8x128xf32>
    %c0_37 = arith.constant 0 : index
    %c0_38 = arith.constant 0 : index
    %74 = vector.load %arg12[%c0_37, %c0_38] : memref<8x128xf32, #tpu.memory_space<vmem>>, vector<8x128xf32>
    tpu.vector_store %arg12[%c0_37, %c0_38], %73 {strides = array<i32>} : memref<8x128xf32, #tpu.memory_space<vmem>>, vector<8x128xf32>,
    return
  }
  func.func @transform_0(%arg0: i32) -> (i32, i32) {
    %c0_i32 = arith.constant 0 : i32
    %c0_i32_0 = arith.constant 0 : i32
    return %arg0, %c0_i32 : i32, i32
  }
  func.func @transform_1(%arg0: i32) -> (i32, i32) {
    %c0_i32 = arith.constant 0 : i32
    %c0_i32_0 = arith.constant 0 : i32
    %c0_i32_1 = arith.constant 0 : i32
    return %c0_i32, %c0_i32_0 : i32, i32
  }
  func.func @transform_2(%arg0: i32) -> (i32, i32) {
    %c0_i32 = arith.constant 0 : i32
    %c0_i32_0 = arith.constant 0 : i32
    %c0_i32_1 = arith.constant 0 : i32
    return %c0_i32, %c0_i32_0 : i32, i32
  }
  func.func @transform_3(%arg0: i32) -> (i32, i32) {
    %c0_i32 = arith.constant 0 : i32
    %c0_i32_0 = arith.constant 0 : i32
    %c0_i32_1 = arith.constant 0 : i32
    return %c0_i32, %c0_i32_0 : i32, i32
  }
  func.func @transform_4(%arg0: i32) -> (i32, i32) {
    %c0_i32 = arith.constant 0 : i32
    %c0_i32_0 = arith.constant 0 : i32
    %c0_i32_1 = arith.constant 0 : i32
    return %c0_i32, %c0_i32_0 : i32, i32
  }
  func.func @transform_5(%arg0: i32) -> (i32, i32) {
    %c0_i32 = arith.constant 0 : i32
    %c0_i32_0 = arith.constant 0 : i32
    %c0_i32_1 = arith.constant 0 : i32
    return %c0_i32, %c0_i32_0 : i32, i32
  }
  func.func @transform_6(%arg0: i32) -> (i32, i32) {
    %c0_i32 = arith.constant 0 : i32
    %c0_i32_0 = arith.constant 0 : i32
    %c0_i32_1 = arith.constant 0 : i32
    return %c0_i32, %c0_i32_0 : i32, i32
  }
  func.func @transform_7(%arg0: i32) -> (i32, i32) {
    %c0_i32 = arith.constant 0 : i32
    %c0_i32_0 = arith.constant 0 : i32
    %c0_i32_1 = arith.constant 0 : i32
    return %c0_i32, %c0_i32_0 : i32, i32
  }
  func.func @transform_8(%arg0: i32) -> (i32, i32) {
    %c0_i32 = arith.constant 0 : i32
    %c0_i32_0 = arith.constant 0 : i32
    %c0_i32_1 = arith.constant 0 : i32
    return %c0_i32, %c0_i32_0 : i32, i32
  }
  func.func @transform_9(%arg0: i32) -> (i32, i32) {
    %c0_i32 = arith.constant 0 : i32
    %c0_i32_0 = arith.constant 0 : i32
    %c0_i32_1 = arith.constant 0 : i32
    return %c0_i32, %c0_i32_0 : i32, i32
  }
  func.func @transform_10(%arg0: i32) -> (i32, i32) {
    %c0_i32 = arith.constant 0 : i32
    %c0_i32_0 = arith.constant 0 : i32
    %c0_i32_1 = arith.constant 0 : i32
    return %c0_i32, %c0_i32_0 : i32, i32
  }
  func.func @transform_11(%arg0: i32) -> (i32, i32) {
    %c0_i32 = arith.constant 0 : i32
    %c0_i32_0 = arith.constant 0 : i32
    return %arg0, %c0_i32 : i32, i32
  }
}

</mosaic_0001>

<bundles_post_ra>
// kernel: _forward_impl.1
= control target key start
LH: loop header
LB: loop body
LE: loop exit
PB: predicated region body
PF: predicated region fallthrough
CT: control target
= control target key end

     0   :  { %16 = vsyncpa [#allocation3], 0  ;;  %s835_s0 = inlined_call_operand.vmem [shape: bf16[8,128], index: 0, kind: input, shape index: {}]   ;;  %s836_s1 = inlined_call_operand.hbm [shape: bf16[128,128], index: 1, kind: input, shape index: {}]   ;;  %s837_s2 = inlined_call_operand.vmem [shape: f32[1,128], index: 2, kind: input, shape index: {}]   ;;  %s838_s3 = inlined_call_operand.vmem [shape: f32[1,128], index: 3, kind: input, shape index: {}]   ;;  %s839_s4 = inlined_call_operand.vmem [shape: f32[1,128], index: 4, kind: input, shape index: {}]   ;;  %s840_s5 = inlined_call_operand.hbm [shape: bf16[128,128], index: 5, kind: input, shape index: {}]   ;;  %s841_s6 = inlined_call_operand.vmem [shape: f32[1,128], index: 6, kind: input, shape index: {}]   ;;  %s842_s7 = inlined_call_operand.vmem [shape: f32[1,128], index: 7, kind: input, shape index: {}]   ;;  %s843_s8 = inlined_call_operand.vmem [shape: f32[1,128], index: 8, kind: input, shape index: {}]   ;;  %s844_s9 = inlined_call_operand.hbm [shape: bf16[128,128], index: 9, kind: input, shape index: {}]   ;;  %s845_s10 = inlined_call_operand.vmem [shape: f32[1,128], index: 10, kind: input, shape index: {}]   ;;  %s846_s11 = inlined_call_operand.vmem [shape: f32[8,128], index: 11, kind: output, shape index: {}]  }
   0x1   :  { %17 = vsyncpa [#allocation5], 0  ;;  %s702_s17 = smov [#allocation4]   ;;  %s703_s19 = smov [#allocation2]  }
   0x2   :  { %s43_s18 = sshll.u32 %s702_s17, 4  ;;  %s25_s20 = sshll.u32 %s703_s19, 4  ;;  %s44_s18 = int_to_ptr.vmem [resolvable:$true] %s43_s18  ;;  %s26_s20 = int_to_ptr.vmem [resolvable:$true] %s25_s20 }
   0x3   :  { %s646_s21 = scalar_lea.vmem %s44_s18, 1024  ;;  %p651_p1 = scmp.lt.s32.totalorder %s44_s18, %s44_s18 }
   0x4   :  { %p647_p0 = scmp.ne.s32.totalorder %s44_s18, %s646_s21  ;;  %p652_p2 = scmp.lt.s32.totalorder %s646_s21, %s646_s21 }
   0x6   :  { %p653_p3 = por %p652_p2, %p651_p1 }
   0x8   :  { %p654_p4 = pnand %p653_p3, %p647_p0 }
   0xa   :  { %657 = shalt.err (!%p654_p4)
}
   0xb   :  { %s704_s22 = smov 64   ;;  %s705_s23 = smov 4  }
   0xc   :  { %49 = dma.hbm_to_vmem [thread:$0]  %s840_s5, 1024, %s44_s18, [#allocation5], %s704_s22, %s704_s22, %s705_s23  }
   0xd   :  { %s666_s26 = scalar_lea.vmem %s26_s20, 1024  ;;  %p671_p6 = scmp.lt.s32.totalorder %s26_s20, %s26_s20 }
   0xe   :  { %p667_p5 = scmp.ne.s32.totalorder %s26_s20, %s666_s26  ;;  %p672_p7 = scmp.lt.s32.totalorder %s666_s26, %s666_s26 }
  0x10   :  { %p673_p8 = por %p672_p7, %p671_p6 }
  0x12   :  { %p674_p9 = pnand %p673_p8, %p667_p5 }
  0x14   :  { %677 = shalt.err (!%p674_p9)
}
  0x15   :  { %31 = dma.hbm_to_vmem [thread:$0]  %s836_s1, 1024, %s26_s20, [#allocation3], %s704_s22, %s704_s22, %s705_s23  }
  0x16   :  { %s706_s29 = smov [#allocation6]  }
  0x17   :  { %s61_s30 = sshll.u32 %s706_s29, 4  ;;  %s62_s30 = int_to_ptr.vmem [resolvable:$true] %s61_s30 }
  0x18   :  { %s686_s12 = scalar_lea.vmem %s62_s30, 1024  ;;  %p691_p11 = scmp.lt.s32.totalorder %s62_s30, %s62_s30 }
  0x19   :  { %p687_p10 = scmp.ne.s32.totalorder %s62_s30, %s686_s12  ;;  %p692_p12 = scmp.lt.s32.totalorder %s686_s12, %s686_s12 }
  0x1b   :  { %p693_p13 = por %p692_p12, %p691_p11 }
  0x1d   :  { %p694_p0 = pnand %p693_p13, %p687_p10 }
  0x1f   :  { %697 = shalt.err (!%p694_p0)
}
  0x20   :  { %67 = dma.hbm_to_vmem [thread:$0]  %s844_s9, 1024, %s62_s30, [#allocation5], %s704_s22, %s704_s22, %s705_s23  }
  0x21   :  { %698 = dma.done.wait [#allocation3], 1024  }
  0x22   :  { %699 = vsyncadd [#allocation3], 4294966272 }
  0x23   :  { %700 = dma.done.wait [#allocation5], 2048  }
  0x24   :  { %701 = vsyncadd [#allocation5], 4294965248  ;;  %v707_v0 = vmov 0.0   ;;  %vm708_vm0 = vmmov 0   ;;  %v610_v1 = vld [vmem:[#allocation2 + $0x38] sm:$0xff]   ;;  %v611_v2 = vld [vmem:[#allocation2 + $0x30] sm:$0xff]  }
  0x25   :  { %543 = vmatprep.subr.bf16.mxu0 %v707_v0  ;;  %559 = vmatprep.mubr.msk.bf16.mxu0 %vm708_vm0, %v707_v0  ;;  %v612_v3 = vld [vmem:[#allocation2 + $0x28] sm:$0xff]   ;;  %v613_v4 = vld [vmem:[#allocation2 + $0x20] sm:$0xff]   ;;  %v614_v5 = vld [vmem:[#allocation2 + $0x18] sm:$0xff]  }
  0x26   :  { %563 = vmatprep.subr.bf16.mxu1 %v707_v0  ;;  %579 = vmatprep.mubr.msk.bf16.mxu1 %vm708_vm0, %v707_v0  ;;  %v615_v6 = vld [vmem:[#allocation2 + $0x10] sm:$0xff]   ;;  %v616_v7 = vld [vmem:[#allocation2 + $0x8] sm:$0xff]   ;;  %v617_v8 = vld [vmem:[#allocation2] sm:$0xff]  }
  0x27   :  { %544 = vmatpush3.bf16.msra.mxu0 %v610_v1  ;;  %v80_v9 = vld [vmem:[%s835_s0] sm:$0xf]  ;;  %v618_v18 = vld [vmem:[#allocation4 + $0x38] sm:$0xff]   ;;  %v619_v19 = vld [vmem:[#allocation4 + $0x30] sm:$0xff]  }
  0x28   :  { %545 = vmatprep.subr.bf16.mxu0 %v707_v0  ;;  %v485_v10 = vld [vmem:[%s837_s2] ss:$0 sm:$0xff]  ;;  %564 = vmatpush3.bf16.msra.mxu1 %v618_v18  ;;  %v620_v20 = vld [vmem:[#allocation4 + $0x28] sm:$0xff]   ;;  %v622_v22 = vld [vmem:[#allocation4 + $0x18] sm:$0xff]  }
  0x29   :  { %565 = vmatprep.subr.bf16.mxu1 %v707_v0  ;;  %v621_v21 = vld [vmem:[#allocation4 + $0x20] sm:$0xff]   ;;  %v623_v23 = vld [vmem:[#allocation4 + $0x10] sm:$0xff]   ;;  %v624_v24 = vld [vmem:[#allocation4 + $0x8] sm:$0xff]  }
  0x2a   :  { %v625_v25 = vld [vmem:[#allocation4] sm:$0xff]   ;;  %v626_v50 = vld [vmem:[#allocation6 + $0x38] sm:$0xff]   ;;  %v627_v51 = vld [vmem:[#allocation6 + $0x30] sm:$0xff]  }
  0x2b   :  { %546 = vmatpush3.bf16.msra.mxu0 %v611_v2  ;;  %v494_v36 = vld [vmem:[%s838_s3] ss:$0 sm:$0xff]  ;;  %v628_v52 = vld [vmem:[#allocation6 + $0x28] sm:$0xff]   ;;  %v630_v54 = vld [vmem:[#allocation6 + $0x18] sm:$0xff]  }
  0x2c   :  { %547 = vmatprep.subr.bf16.mxu0 %v707_v0  ;;  %566 = vmatpush3.bf16.msra.mxu1 %v619_v19  ;;  %v495_v38 = vld [vmem:[%s839_s4] ss:$0 sm:$0xff]  ;;  %v631_v55 = vld [vmem:[#allocation6 + $0x10] sm:$0xff]   ;;  %v632_v56 = vld [vmem:[#allocation6 + $0x8] sm:$0xff]  }
  0x2d   :  { %567 = vmatprep.subr.bf16.mxu1 %v707_v0  ;;  %v496_v42 = vld [vmem:[%s841_s6] ss:$0 sm:$0xff] }
  0x2e   :  { %v629_v53 = vld [vmem:[#allocation6 + $0x20] sm:$0xff]  }
  0x2f   :  { %548 = vmatpush3.bf16.msra.mxu0 %v612_v3  ;;  %v633_v57 = vld [vmem:[#allocation6] sm:$0xff]  }
  0x30   :  { %549 = vmatprep.subr.bf16.mxu0 %v707_v0  ;;  %568 = vmatpush3.bf16.msra.mxu1 %v620_v20 }
  0x31   :  { %569 = vmatprep.subr.bf16.mxu1 %v707_v0 }
  0x33   :  { %550 = vmatpush3.bf16.msra.mxu0 %v613_v4 }
  0x34   :  { %551 = vmatprep.subr.bf16.mxu0 %v707_v0  ;;  %570 = vmatpush3.bf16.msra.mxu1 %v621_v21 }
  0x35   :  { %571 = vmatprep.subr.bf16.mxu1 %v707_v0 }
  0x37   :  { %552 = vmatpush3.bf16.msra.mxu0 %v614_v5  ;;  %v505_v5 = vld [vmem:[%s842_s7] ss:$0 sm:$0xff] }
  0x38   :  { %553 = vmatprep.subr.bf16.mxu0 %v707_v0  ;;  %572 = vmatpush3.bf16.msra.mxu1 %v622_v22 }
  0x39   :  { %573 = vmatprep.subr.bf16.mxu1 %v707_v0 }
  0x3b   :  { %554 = vmatpush3.bf16.msra.mxu0 %v615_v6 }
  0x3c   :  { %555 = vmatprep.subr.bf16.mxu0 %v707_v0  ;;  %574 = vmatpush3.bf16.msra.mxu1 %v623_v23 }
  0x3d   :  { %575 = vmatprep.subr.bf16.mxu1 %v707_v0 }
  0x3f   :  { %556 = vmatpush3.bf16.msra.mxu0 %v616_v7 }
  0x40   :  { %557 = vmatprep.subr.bf16.mxu0 %v707_v0  ;;  %576 = vmatpush3.bf16.msra.mxu1 %v624_v24 }
  0x41   :  { %577 = vmatprep.subr.bf16.mxu1 %v707_v0 }
  0x43   :  { %558 = vmatpush3.bf16.msra.mxu0 %v617_v8 }
  0x44   :  { %583 = vmatprep.subr.bf16.mxu0 %v707_v0  ;;  %578 = vmatpush3.bf16.msra.mxu1 %v625_v25 }
  0x46   :  { %560 = vmatmul.mubr.bf16.vlgmr.msra.gmra.mxu0 %v80_v9 }
  0x47   :  { %599 = vmatprep.mubr.msk.bf16.mxu0 %vm708_vm0, %v707_v0  ;;  %584 = vmatpush3.bf16.msra.mxu0 %v626_v50 }
  0x48   :  { %585 = vmatprep.subr.bf16.mxu0 %v707_v0 }
  0x4b   :  { %586 = vmatpush3.bf16.msra.mxu0 %v627_v51 }
  0x4c   :  { %587 = vmatprep.subr.bf16.mxu0 %v707_v0 }
  0x4f   :  { %588 = vmatpush3.bf16.msra.mxu0 %v628_v52 }
  0x50   :  { %589 = vmatprep.subr.bf16.mxu0 %v707_v0 }
  0x53   :  { %590 = vmatpush3.bf16.msra.mxu0 %v629_v53 }
  0x54   :  { %591 = vmatprep.subr.bf16.mxu0 %v707_v0 }
  0x57   :  { %592 = vmatpush3.bf16.msra.mxu0 %v630_v54 }
  0x58   :  { %593 = vmatprep.subr.bf16.mxu0 %v707_v0 }
  0x5b   :  { %594 = vmatpush3.bf16.msra.mxu0 %v631_v55 }
  0x5c   :  { %595 = vmatprep.subr.bf16.mxu0 %v707_v0 }
  0x5f   :  { %596 = vmatpush3.bf16.msra.mxu0 %v632_v56 }
  0x60   :  { %597 = vmatprep.subr.bf16.mxu0 %v707_v0  ;;  %v506_v0 = vld [vmem:[%s843_s8] ss:$0 sm:$0xff] }
  0x63   :  { %598 = vmatpush3.bf16.msra.mxu0 %v633_v57 }
 0x106   :  { %v186_v11 = vpop.f32.mrf.mxu0 }
 0x107   :  { %v187_v12 = vadd.f32 %v485_v10, %v186_v11  ;;  %v507_v10 = vld [vmem:[%s845_s10] ss:$0 sm:$0xff] }
 0x108   :  { %v561_v13 = vpop.f32.mrf.mxu0 }
 0x109   :  { %v192_v14 = vmax.f32 %v187_v12, 0.0 }
 0x10a   :  { %v189_v15 = vpop.f32.mrf.mxu0 }
 0x10b   :  { %193 = vadd.xlane.f32.xlu0 %v192_v14  ;;  %v196_v17 = vmul.f32 %v192_v14, %v192_v14 }
 0x10c   :  { %v562_v16 = vpop.f32.mrf.mxu0 }
 0x10f   :  { %197 = vadd.xlane.f32.xlu0 %v196_v17 }
 0x194   :  { %v194_v26 = vpop.xlane.xlu0 %193 }
 0x195   :  { %v195_v27 = vmul.f32 0.03125, %v194_v26 }
 0x197   :  { %v200_v29 = vmul.f32 %v195_v27, %v195_v27  ;;  %v203_v34 = vsub.f32 %v192_v14, %v195_v27 }
 0x198   :  { %v198_v28 = vpop.xlane.xlu0 %197 }
 0x199   :  { %v199_v30 = vmul.f32 0.03125, %v198_v28 }
 0x19b   :  { %v201_v31 = vsub.f32 %v199_v30, %v200_v29 }
 0x19d   :  { %v202_v32 = vmax.f32 %v201_v31, 0.0 }
 0x19f   :  { %v204_v33 = vadd.f32 1e-05, %v202_v32 }
 0x1a1   :  { %634 = vrsqrt.f32 %v204_v33 }
 0x1ae   :  { %v635_v35 = vpop.eup %634 }
 0x1af   :  { %v206_v37 = vmul.f32 %v635_v35, %v203_v34 }
 0x1b1   :  { %v214_v39 = vmul.f32 %v494_v36, %v206_v37 }
 0x1b3   :  { %v222_v40 = vadd.f32 %v495_v38, %v214_v39 }
 0x1b5   :  { %v223_v41 = vpack.c.bf16 %v222_v40, %v222_v40 }
 0x1b7   :  { %580 = vmatmul.mubr.bf16.vlgmr.msra.gmra.mxu1 %v223_v41 }
 0x277   :  { %v329_v43 = vpop.f32.mrf.mxu1 }
 0x278   :  { %v330_v44 = vadd.f32 %v496_v42, %v329_v43 }
 0x279   :  { %v581_v45 = vpop.f32.mrf.mxu1 }
 0x27a   :  { %v335_v46 = vmax.f32 %v330_v44, 0.0 }
 0x27b   :  { %v332_v47 = vpop.f32.mrf.mxu1 }
 0x27c   :  { %336 = vadd.xlane.f32.xlu1 %v335_v46  ;;  %v339_v49 = vmul.f32 %v335_v46, %v335_v46 }
 0x27d   :  { %v582_v48 = vpop.f32.mrf.mxu1 }
 0x280   :  { %340 = vadd.xlane.f32.xlu1 %v339_v49 }
 0x305   :  { %v337_v58 = vpop.xlane.xlu1 %336 }
 0x306   :  { %v338_v59 = vmul.f32 0.03125, %v337_v58 }
 0x308   :  { %v343_v61 = vmul.f32 %v338_v59, %v338_v59  ;;  %v346_v3 = vsub.f32 %v335_v46, %v338_v59 }
 0x309   :  { %v341_v60 = vpop.xlane.xlu1 %340 }
 0x30a   :  { %v342_v62 = vmul.f32 0.03125, %v341_v60 }
 0x30c   :  { %v344_v63 = vsub.f32 %v342_v62, %v343_v61 }
 0x30e   :  { %v345_v1 = vmax.f32 %v344_v63, 0.0 }
 0x310   :  { %v347_v2 = vadd.f32 1e-05, %v345_v1 }
 0x312   :  { %636 = vrsqrt.f32 %v347_v2 }
 0x31f   :  { %v637_v4 = vpop.eup %636 }
 0x320   :  { %v349_v6 = vmul.f32 %v637_v4, %v346_v3 }
 0x322   :  { %v357_v7 = vmul.f32 %v505_v5, %v349_v6 }
 0x324   :  { %v365_v8 = vadd.f32 %v506_v0, %v357_v7 }
 0x326   :  { %v366_v9 = vpack.c.bf16 %v365_v8, %v365_v8 }
 0x328   :  { %600 = vmatmul.mubr.bf16.vlgmr.msra.gmra.mxu0 %v366_v9 }
 0x3e8   :  { %v472_v11 = vpop.f32.mrf.mxu0 }
 0x3e9   :  { %v473_v12 = vadd.f32 %v507_v10, %v472_v11 }
 0x3ea   :  { %v601_v13 = vpop.f32.mrf.mxu0 }
 0x3eb   :  { %478 = vst [vmem:[%s846_s11] sm:$0xff] %v473_v12 }
 0x3ec   :  { %v475_v14 = vpop.f32.mrf.mxu0 }
 0x3ee   :  { %v602_v15 = vpop.f32.mrf.mxu0 }
 0x3ef   :  { %483 = vsyncpa [#allocation3], 1 }
 0x3f0   :  { %484 = vsyncpa [#allocation5], 1 }

</bundles_post_ra>
